<compile_context>
chip_gen: v5e
topology: v5e:2x2
jax: 0.10.0
libtpu: 0.0.40
codegen_flags: <defaults>
</compile_context>

<pallas_src>
import jax
import jax.numpy as jnp
from jax.experimental import pallas as pl
from jax.experimental.pallas import tpu as pltpu

N_OUT = 10      # real number of classes
N_PAD = 128     # lane-dense padded output width (keep 128 on all generations)
TB_MAX = 1024   # max batch rows per tile (safe for v5e/v6e/v7x scoped VMEM)


def _round_up(x, m):
    return (x + m - 1) // m * m


def _pick_tb(B):
    """Batch tile: single full tile for tiny B; otherwise aim for >=4 grid
    steps (so v7x megacore can shard) while staying sublane-aligned and
    capped at TB_MAX."""
    if B <= 8:
        return B                                   # full-extent single tile
    return min(TB_MAX, _round_up(-(-B // 4), 8))   # cdiv(B,4) rounded to 8


def _linear_kernel(x_ref, w_ref, b_ref, o_ref):
    # x_ref: (TB, 784) bf16, w_ref: (784, 128) bf16 (resident),
    # b_ref: (1, 128) f32 (resident), o_ref: (TB, 128) f32
    acc = jnp.dot(x_ref[...], w_ref[...], preferred_element_type=jnp.float32)
    o_ref[...] = (acc + b_ref[...]).astype(o_ref.dtype)


def _linear_emb_kernel(x_ref, e_ref, w_ref, we_ref, b_ref, o_ref):
    # Same as above plus a tiny second matmul for the quantum embedding:
    # e_ref: (TB, E) bf16, we_ref: (E, 128) bf16 (resident).
    acc = jnp.dot(x_ref[...], w_ref[...], preferred_element_type=jnp.float32)
    acc = acc + jnp.dot(e_ref[...], we_ref[...],
                        preferred_element_type=jnp.float32)
    o_ref[...] = (acc + b_ref[...]).astype(o_ref.dtype)


def mnist_forward_padded(xb, w_t, b, emb=None):
    """Lane-dense logits slab (B, 128); columns >= 10 are bias-only padding."""
    B = xb.shape[0]
    K = 784
    x = xb.reshape(B, K).astype(jnp.bfloat16)        # glue: torch .view(-1, 784)

    has_emb = emb is not None
    if has_emb:
        E = emb.shape[1]
        assert w_t.shape == (K + E, N_OUT)
        emb = emb.astype(jnp.bfloat16)
        w_x, w_e = w_t[:K], w_t[K:]
    else:
        assert w_t.shape == (K, N_OUT)
        w_x = w_t

    # Only the tiny weights / bias are padded to the 128-wide lane-dense N.
    w_pad = jnp.pad(w_x, ((0, 0), (0, N_PAD - N_OUT))).astype(jnp.bfloat16)
    b_pad = jnp.pad(b.reshape(1, N_OUT),
                    ((0, 0), (0, N_PAD - N_OUT))).astype(jnp.float32)

    TB = _pick_tb(B)
    grid = (pl.cdiv(B, TB),)                         # ragged last tile is fine

    flops = 2 * B * K * N_PAD
    bytes_accessed = B * K * 2 + K * N_PAD * 2 + B * N_PAD * 4 + N_PAD * 4
    if has_emb:
        flops += 2 * B * E * N_PAD
        bytes_accessed += B * E * 2 + E * N_PAD * 2

    compiler_params = pltpu.CompilerParams(
        dimension_semantics=("parallel",))            # megacore sharding on v7x
    cost = pl.CostEstimate(flops=flops, transcendentals=0,
                           bytes_accessed=bytes_accessed)

    if has_emb:
        return pl.pallas_call(
            _linear_emb_kernel,
            out_shape=jax.ShapeDtypeStruct((B, N_PAD), jnp.float32),
            grid=grid,
            in_specs=[
                pl.BlockSpec((TB, K), lambda i: (i, 0)),      # x: batch-tiled
                pl.BlockSpec((TB, E), lambda i: (i, 0)),      # emb: batch-tiled
                pl.BlockSpec((K, N_PAD), lambda i: (0, 0)),   # W: resident
                pl.BlockSpec((E, N_PAD), lambda i: (0, 0)),   # W_emb: resident
                pl.BlockSpec((1, N_PAD), lambda i: (0, 0)),   # b: resident
            ],
            out_specs=pl.BlockSpec((TB, N_PAD), lambda i: (i, 0)),
            compiler_params=compiler_params,
            cost_estimate=cost,
        )(x, emb, w_pad, w_e_padded := jnp.pad(
            w_e, ((0, 0), (0, N_PAD - N_OUT))).astype(jnp.bfloat16), b_pad) \
            if False else pl.pallas_call(  # (kept explicit below for clarity)
            _linear_emb_kernel,
            out_shape=jax.ShapeDtypeStruct((B, N_PAD), jnp.float32),
            grid=grid,
            in_specs=[
                pl.BlockSpec((TB, K), lambda i: (i, 0)),
                pl.BlockSpec((TB, E), lambda i: (i, 0)),
                pl.BlockSpec((K, N_PAD), lambda i: (0, 0)),
                pl.BlockSpec((E, N_PAD), lambda i: (0, 0)),
                pl.BlockSpec((1, N_PAD), lambda i: (0, 0)),
            ],
            out_specs=pl.BlockSpec((TB, N_PAD), lambda i: (i, 0)),
            compiler_params=compiler_params,
            cost_estimate=cost,
        )(x, emb, w_pad,
          jnp.pad(w_e, ((0, 0), (0, N_PAD - N_OUT))).astype(jnp.bfloat16),
          b_pad)

    return pl.pallas_call(
        _linear_kernel,
        out_shape=jax.ShapeDtypeStruct((B, N_PAD), jnp.float32),
        grid=grid,
        in_specs=[
            pl.BlockSpec((TB, K), lambda i: (i, 0)),          # x: batch-tiled
            pl.BlockSpec((K, N_PAD), lambda i: (0, 0)),       # W: resident
            pl.BlockSpec((1, N_PAD), lambda i: (0, 0)),       # b: resident
        ],
        out_specs=pl.BlockSpec((TB, N_PAD), lambda i: (i, 0)),
        compiler_params=compiler_params,
        cost_estimate=cost,
    )(x, w_pad, b_pad)


@jax.jit
def mnist_forward(xb, w_t, b, emb=None):
    """Pallas implementation of MnistModel.forward -> (B, 10) f32 logits."""
    out = mnist_forward_padded(xb, w_t, b, emb)
    # Semantics-preserving slice; fusion-friendly consumers should instead use
    # mnist_forward_padded directly and read only the first 10 columns.
    return out[:, :N_OUT]


def init_params(key, embedding_size=0):
    """Deterministic nn.Linear-style init (uniform +/- 1/sqrt(fan_in))."""
    input_size = 28 * 28 + embedding_size
    k_w, k_b = jax.random.split(key)
    bound = 1.0 / jnp.sqrt(jnp.float32(input_size))
    # PyTorch weight is (10, input_size); keep it transposed for the kernel.
    w = jax.random.uniform(k_w, (10, input_size), jnp.float32, -bound, bound)
    b = jax.random.uniform(k_b, (10,), jnp.float32, -bound, bound)
    return w.T, b


if __name__ == "__main__":
    key = jax.random.PRNGKey(0)
    k_x, k_p, k_e, k_p2 = jax.random.split(key, 4)

    # --- default config: no quantum embedding ---
    B = 2
    xb = jax.random.normal(k_x, (B, 1, 28, 28), jnp.float32)
    w_t, b = init_params(k_p, embedding_size=0)

    out = mnist_forward(xb, w_t, b)
    jax.block_until_ready(out)
    ref = xb.reshape(B, 784) @ w_t + b[None, :]
    assert out.shape == (B, N_OUT)
    assert jnp.allclose(out, ref, atol=5e-2, rtol=5e-2), "mismatch (no emb)"

    # --- embedding path: input_size = 784 + embedding_size ---
    emb_size = 8
    emb = jax.random.normal(k_e, (B, emb_size), jnp.float32)
    w_t2, b2 = init_params(k_p2, embedding_size=emb_size)

    out2 = mnist_forward(xb, w_t2, b2, emb)
    jax.block_until_ready(out2)
    ref2 = jnp.concatenate([xb.reshape(B, 784), emb], axis=1) @ w_t2 + b2[None, :]
    assert out2.shape == (B, N_OUT)
    assert jnp.allclose(out2, ref2, atol=5e-2, rtol=5e-2), "mismatch (emb)"

    print("KERNEL_OK")
</pallas_src>

<mosaic_0001>
module attributes {stable_mosaic.version = 11 : i64} {
  func.func @_linear_kernel(%arg0: i32, %arg1: memref<2x784xbf16, #tpu.memory_space<vmem>>, %arg2: memref<784x128xbf16, #tpu.memory_space<vmem>>, %arg3: memref<1x128xf32, #tpu.memory_space<vmem>>, %arg4: memref<2x128xf32, #tpu.memory_space<vmem>>) attributes {dimension_semantics = [#tpu.dimension_semantics<parallel>], iteration_bounds = array<i64: 1>, scalar_prefetch = 0 : i64, scratch_operands = 0 : i64, tpu.core_type = #tpu.core_type<tc>, window_params = [{transform_indices = @transform_0, window_bounds = array<i64: 2, 784>}, {pipeline_mode = #tpu.pipeline_mode<synchronous>, transform_indices = @transform_1, window_bounds = array<i64: 784, 128>}, {pipeline_mode = #tpu.pipeline_mode<synchronous>, transform_indices = @transform_2, window_bounds = array<i64: 1, 128>}, {transform_indices = @transform_3, window_bounds = array<i64: 2, 128>}]} {
    %c0 = arith.constant 0 : index
    %c0_0 = arith.constant 0 : index
    %0 = vector.load %arg1[%c0, %c0_0] : memref<2x784xbf16, #tpu.memory_space<vmem>>, vector<2x784xbf16>
    %c0_1 = arith.constant 0 : index
    %c0_2 = arith.constant 0 : index
    %1 = vector.load %arg2[%c0_1, %c0_2] : memref<784x128xbf16, #tpu.memory_space<vmem>>, vector<784x128xbf16>
    %cst = arith.constant dense<0.000000e+00> : vector<2x128xf32>
    %2 = tpu.matmul %0, %1, %cst {dimension_numbers = #tpu.dot_dimension_numbers<[1], [0], [0], [1], [0, 0, 1, 1], [], []>} : vector<2x784xbf16>, vector<784x128xbf16>, vector<2x128xf32> -> vector<2x128xf32>
    %c0_3 = arith.constant 0 : index
    %c0_4 = arith.constant 0 : index
    %3 = vector.load %arg3[%c0_3, %c0_4] : memref<1x128xf32, #tpu.memory_space<vmem>>, vector<1x128xf32>
    %4 = vector.broadcast %3 : vector<1x128xf32> to vector<2x128xf32>
    %5 = arith.addf %2, %4 : vector<2x128xf32>
    %c0_5 = arith.constant 0 : index
    %c0_6 = arith.constant 0 : index
    %6 = vector.load %arg4[%c0_5, %c0_6] : memref<2x128xf32, #tpu.memory_space<vmem>>, vector<2x128xf32>
    tpu.vector_store %arg4[%c0_5, %c0_6], %5 {strides = array<i32>} : memref<2x128xf32, #tpu.memory_space<vmem>>, vector<2x128xf32>,
    return
  }
  func.func @transform_0(%arg0: i32) -> (i32, i32) {
    %c0_i32 = arith.constant 0 : i32
    %c0_i32_0 = arith.constant 0 : i32
    return %arg0, %c0_i32 : i32, i32
  }
  func.func @transform_1(%arg0: i32) -> (i32, i32) {
    %c0_i32 = arith.constant 0 : i32
    %c0_i32_0 = arith.constant 0 : i32
    %c0_i32_1 = arith.constant 0 : i32
    return %c0_i32, %c0_i32_0 : i32, i32
  }
  func.func @transform_2(%arg0: i32) -> (i32, i32) {
    %c0_i32 = arith.constant 0 : i32
    %c0_i32_0 = arith.constant 0 : i32
    %c0_i32_1 = arith.constant 0 : i32
    return %c0_i32, %c0_i32_0 : i32, i32
  }
  func.func @transform_3(%arg0: i32) -> (i32, i32) {
    %c0_i32 = arith.constant 0 : i32
    %c0_i32_0 = arith.constant 0 : i32
    return %arg0, %c0_i32 : i32, i32
  }
}

</mosaic_0001>

<bundles_post_ra>
// kernel: mnist_forward.1
= control target key start
LH: loop header
LB: loop body
LE: loop exit
PB: predicated region body
PF: predicated region fallthrough
CT: control target
= control target key end

     0   :  { %s990_s0 = inlined_call_operand.vmem [shape: bf16[2,784], index: 0, kind: input, shape index: {}]   ;;  %s991_s1 = inlined_call_operand.vmem [shape: bf16[784,128], index: 1, kind: input, shape index: {}]   ;;  %s992_s2 = inlined_call_operand.vmem [shape: f32[1,128], index: 2, kind: input, shape index: {}]   ;;  %s993_s3 = inlined_call_operand.hbm [shape: f32[2,128], index: 3, kind: output, shape index: {}]  }
   0x1   :  { %v743_v0 = vld [vmem:[%s991_s1 + $0x38] sm:$0xff]  ;;  %v742_v3 = vld [vmem:[%s991_s1 + $0x30] sm:$0xff]  ;;  %v741_v8 = vld [vmem:[%s991_s1 + $0x28] sm:$0xff] }
   0x2   :  { %v751_v1 = vld [vmem:[%s991_s1 + $0x78] sm:$0xff]  ;;  %431 = vmatpush.bf16.msra.mxu0 %v743_v0  ;;  %v750_v4 = vld [vmem:[%s991_s1 + $0x70] sm:$0xff]  ;;  %v749_v9 = vld [vmem:[%s991_s1 + $0x68] sm:$0xff] }
   0x3   :  { %v759_v2 = vld [vmem:[%s991_s1 + $0xb8] sm:$0xff]  ;;  %444 = vmatpush.bf16.msra.mxu1 %v751_v1  ;;  %v758_v5 = vld [vmem:[%s991_s1 + $0xb0] sm:$0xff]  ;;  %v757_v10 = vld [vmem:[%s991_s1 + $0xa8] sm:$0xff] }
   0x4   :  { %457 = vmatpush.bf16.msra.mxu2 %v759_v2  ;;  %v767_v6 = vld [vmem:[%s991_s1 + $0xf8] sm:$0xff]  ;;  %v766_v7 = vld [vmem:[%s991_s1 + $0xf0] sm:$0xff]  ;;  %v765_v11 = vld [vmem:[%s991_s1 + $0xe8] sm:$0xff] }
   0x5   :  { %470 = vmatpush.bf16.msra.mxu3 %v767_v6  ;;  %v740_v12 = vld [vmem:[%s991_s1 + $0x20] sm:$0xff]  ;;  %v739_v17 = vld [vmem:[%s991_s1 + $0x18] sm:$0xff] }
   0x6   :  { %432 = vmatpush.bf16.msra.mxu0 %v742_v3  ;;  %v748_v13 = vld [vmem:[%s991_s1 + $0x60] sm:$0xff]  ;;  %v747_v18 = vld [vmem:[%s991_s1 + $0x58] sm:$0xff] }
   0x7   :  { %445 = vmatpush.bf16.msra.mxu1 %v750_v4  ;;  %v16_v14 = vld [vmem:[%s990_s0] sm:$0x7f]  ;;  %v755_v19 = vld [vmem:[%s991_s1 + $0x98] sm:$0xff] }
   0x8   :  { %458 = vmatpush.bf16.msra.mxu2 %v758_v5  ;;  %v756_v15 = vld [vmem:[%s991_s1 + $0xa0] sm:$0xff]  ;;  %120 = vst [vmem:[#allocation1] ss:$9 sm:$0xff] %v16_v14 }
   0x9   :  { %471 = vmatpush.bf16.msra.mxu3 %v766_v7  ;;  %v764_v16 = vld [vmem:[%s991_s1 + $0xe0] sm:$0xff] }
   0xa   :  { %433 = vmatpush.bf16.msra.mxu0 %v741_v8 }
   0xb   :  { %446 = vmatpush.bf16.msra.mxu1 %v749_v9 }
   0xc   :  { %459 = vmatpush.bf16.msra.mxu2 %v757_v10 }
   0xd   :  { %472 = vmatpush.bf16.msra.mxu3 %v765_v11 }
   0xe   :  { %434 = vmatpush.bf16.msra.mxu0 %v740_v12 }
   0xf   :  { %447 = vmatpush.bf16.msra.mxu1 %v748_v13 }
  0x10   :  { %460 = vmatpush.bf16.msra.mxu2 %v756_v15 }
  0x11   :  { %8 = vsyncpa [#allocation3], 0  ;;  %473 = vmatpush.bf16.msra.mxu3 %v764_v16  ;;  %v763_v20 = vld [vmem:[%s991_s1 + $0xd8] sm:$0xff]  ;;  %v738_v21 = vld [vmem:[%s991_s1 + $0x10] sm:$0xff]  ;;  %vm428_vm0 = vcmask 130048   ;;  %s530_s6 = sshll.u32 %s993_s3, 4  ;;  %s531_s6 = int_to_ptr.hbm [resolvable:$true] %s530_s6 }
  0x12   :  { %435 = vmatpush.bf16.msra.mxu0 %v739_v17  ;;  %v746_v22 = vld [vmem:[%s991_s1 + $0x50] sm:$0xff]  ;;  %v737_v25 = vld [vmem:[%s991_s1 + $0x8] sm:$0xff]  ;;  %v736_v29 = vld [vmem:[%s991_s1] sm:$0xff] }
  0x13   :  { %448 = vmatpush.bf16.msra.mxu1 %v747_v18  ;;  %v754_v23 = vld [vmem:[%s991_s1 + $0x90] sm:$0xff]  ;;  %v745_v26 = vld [vmem:[%s991_s1 + $0x48] sm:$0xff]  ;;  %v744_v30 = vld [vmem:[%s991_s1 + $0x40] sm:$0xff] }
  0x14   :  { %461 = vmatpush.bf16.msra.mxu2 %v755_v19  ;;  %v762_v24 = vld [vmem:[%s991_s1 + $0xd0] sm:$0xff]  ;;  %v753_v27 = vld [vmem:[%s991_s1 + $0x88] sm:$0xff]  ;;  %v752_v31 = vld [vmem:[%s991_s1 + $0x80] sm:$0xff] }
  0x15   :  { %474 = vmatpush.bf16.msra.mxu3 %v763_v20  ;;  %v761_v28 = vld [vmem:[%s991_s1 + $0xc8] sm:$0xff]  ;;  %v775_v32 = vld [vmem:[%s991_s1 + $0x138] sm:$0xff]  ;;  %v784_v34 = vld [vmem:[%s991_s1 + $0x180] sm:$0xff] }
  0x16   :  { %436 = vmatpush.bf16.msra.mxu0 %v738_v21  ;;  %v783_v33 = vld [vmem:[%s991_s1 + $0x178] sm:$0xff]  ;;  %v121_v35 = vld [vmem:[#allocation1] sm:$0xff]  ;;  %v122_v36 = vld [vmem:[#allocation1 + $0x9] sm:$0xff] }
  0x17   :  { %449 = vmatpush.bf16.msra.mxu1 %v746_v22  ;;  %v760_v37 = vld [vmem:[%s991_s1 + $0xc0] sm:$0xff]  ;;  %v123_v38 = vld [vmem:[#allocation1 + $0x12] sm:$0xff]  ;;  %v773_v42 = vld [vmem:[%s991_s1 + $0x128] sm:$0xff] }
  0x18   :  { %462 = vmatpush.bf16.msra.mxu2 %v754_v23  ;;  %v774_v39 = vld [vmem:[%s991_s1 + $0x130] sm:$0xff]  ;;  %v124_v41 = vld [vmem:[#allocation1 + $0x1b] sm:$0xff]  ;;  %v781_v43 = vld [vmem:[%s991_s1 + $0x168] sm:$0xff] }
  0x19   :  { %475 = vmatpush.bf16.msra.mxu3 %v762_v24  ;;  %v782_v40 = vld [vmem:[%s991_s1 + $0x170] sm:$0xff]  ;;  %v772_v44 = vld [vmem:[%s991_s1 + $0x120] sm:$0xff]  ;;  %v771_v46 = vld [vmem:[%s991_s1 + $0x118] sm:$0xff] }
  0x1a   :  { %437 = vmatpush.bf16.msra.mxu0 %v737_v25  ;;  %v780_v45 = vld [vmem:[%s991_s1 + $0x160] sm:$0xff]  ;;  %v779_v47 = vld [vmem:[%s991_s1 + $0x158] sm:$0xff]  ;;  %v770_v49 = vld [vmem:[%s991_s1 + $0x110] sm:$0xff] }
  0x1b   :  { %450 = vmatpush.bf16.msra.mxu1 %v745_v26  ;;  %v127_v48 = vld [vmem:[#allocation1 + $0x36] sm:$0xff]  ;;  %v769_v51 = vld [vmem:[%s991_s1 + $0x108] sm:$0xff]  ;;  %v768_v53 = vld [vmem:[%s991_s1 + $0x100] sm:$0xff] }
  0x1c   :  { %463 = vmatpush.bf16.msra.mxu2 %v753_v27  ;;  %v778_v50 = vld [vmem:[%s991_s1 + $0x150] sm:$0xff]  ;;  %v777_v52 = vld [vmem:[%s991_s1 + $0x148] sm:$0xff]  ;;  %v776_v54 = vld [vmem:[%s991_s1 + $0x140] sm:$0xff]  ;;  %s813_s1 = smov [#allocation2]  }
  0x1d   :  { %476 = vmatpush.bf16.msra.mxu3 %v761_v28  ;;  %v125_v55 = vld [vmem:[#allocation1 + $0x24] sm:$0xff]  ;;  %v126_v56 = vld [vmem:[#allocation1 + $0x2d] sm:$0xff]  ;;  %v786_v63 = vld [vmem:[%s992_s2] ss:$0 sm:$0xff]  ;;  %s528_s30 = sshll.u32 %s813_s1, 4  ;;  %s529_s30 = int_to_ptr.vmem [resolvable:$true] %s528_s30 }
  0x1e   :  { %438 = vmatpush.bf16.msra.mxu0 %v736_v29 }
  0x1f   :  { %451 = vmatpush.bf16.msra.mxu1 %v744_v30 }
  0x20   :  { %464 = vmatpush.bf16.msra.mxu2 %v752_v31 }
  0x21   :  { %439 = vmatmul.bf16.vlgmr.msra.gmra.mxu0 %v121_v35  ;;  %477 = vmatpush.bf16.msra.mxu3 %v760_v37 }
  0x22   :  { %483 = vmatpush.bf16.msrb.mxu0 %v775_v32  ;;  %452 = vmatmul.bf16.vlgmr.msra.gmra.mxu1 %v122_v36 }
  0x23   :  { %496 = vmatpush.bf16.msrb.mxu1 %v783_v33  ;;  %465 = vmatmul.bf16.vlgmr.msra.gmra.mxu2 %v123_v38 }
  0x24   :  { %516 = vmatpush.bf16.msrb.mxu2 %v784_v34  ;;  %478 = vmatmul.bf16.vlgmr.msra.gmra.mxu3 %v124_v41 }
  0x26   :  { %484 = vmatpush.bf16.msrb.mxu0 %v774_v39 }
  0x27   :  { %497 = vmatpush.bf16.msrb.mxu1 %v782_v40 }
  0x2a   :  { %485 = vmatpush.bf16.msrb.mxu0 %v773_v42 }
  0x2b   :  { %498 = vmatpush.bf16.msrb.mxu1 %v781_v43 }
  0x2e   :  { %486 = vmatpush.bf16.msrb.mxu0 %v772_v44 }
  0x2f   :  { %499 = vmatpush.bf16.msrb.mxu1 %v780_v45 }
  0x32   :  { %487 = vmatpush.bf16.msrb.mxu0 %v771_v46 }
  0x33   :  { %500 = vmatpush.bf16.msrb.mxu1 %v779_v47  ;;  %735 = vmatmul.msk.bf16.vlgmr.msrb.gmra.mxu2 %vm428_vm0, %v127_v48 }
  0x36   :  { %488 = vmatpush.bf16.msrb.mxu0 %v770_v49 }
  0x37   :  { %501 = vmatpush.bf16.msrb.mxu1 %v778_v50 }
  0x3a   :  { %489 = vmatpush.bf16.msrb.mxu0 %v769_v51 }
  0x3b   :  { %502 = vmatpush.bf16.msrb.mxu1 %v777_v52 }
  0x3e   :  { %490 = vmatpush.bf16.msrb.mxu0 %v768_v53 }
  0x3f   :  { %503 = vmatpush.bf16.msrb.mxu1 %v776_v54 }
  0x41   :  { %491 = vmatmul.bf16.vlgmr.msrb.gmra.mxu0 %v125_v55 }
  0x42   :  { %504 = vmatmul.bf16.vlgmr.msrb.gmra.mxu1 %v126_v56 }
  0x9e   :  { %v440_v57 = vpop.f32.mrf.mxu0 }
  0x9f   :  { %v453_v58 = vpop.f32.mrf.mxu1  ;;  %v441_v1 = vadd.f32 %v786_v63, %v440_v57 }
  0xa1   :  { %v454_v3 = vadd.f32 %v453_v58, %v441_v1 }
  0xa6   :  { %v466_v59 = vpop.f32.mrf.mxu2  ;;  %v442_v60 = vpop.f32.mrf.mxu0 }
  0xa7   :  { %v455_v61 = vpop.f32.mrf.mxu1  ;;  %v479_v62 = vpop.f32.mrf.mxu3  ;;  %v467_v5 = vadd.f32 %v466_v59, %v454_v3 }
  0xa9   :  { %v480_v6 = vadd.f32 %v479_v62, %v467_v5 }
  0xae   :  { %v468_v0 = vpop.f32.mrf.mxu2 }
  0xaf   :  { %v481_v2 = vpop.f32.mrf.mxu3 }
  0xb6   :  { %v518_v4 = vpop.f32.mrf.mxu2 }
  0xbe   :  { %v492_v7 = vpop.f32.mrf.mxu0  ;;  %v520_v10 = vpop.f32.mrf.mxu2 }
  0xbf   :  { %v493_v8 = vadd.f32 %v492_v7, %v480_v6  ;;  %v505_v9 = vpop.f32.mrf.mxu1 }
  0xc1   :  { %v506_v11 = vadd.f32 %v505_v9, %v493_v8 }
  0xc3   :  { %v519_v12 = vadd.f32 %v518_v4, %v506_v11 }
  0xc5   :  { %522 = vst [vmem:[#allocation2] sm:$0x3] %v519_v12 }
  0xc6   :  { %v494_v13 = vpop.f32.mrf.mxu0  ;;  %533 = dma.vmem_to_hbm [thread:$0]  %s529_s30, 32, %s531_s6, [#allocation3]  }
  0xc7   :  { %v507_v14 = vpop.f32.mrf.mxu1 }
  0xc8   :  { %811 = dma.done.wait [#allocation3], 32  }
  0xc9   :  { %812 = vsyncadd [#allocation3], 4294967264 }
  0xca   :  { %538 = vsyncpa [#allocation3], 1 }

</bundles_post_ra>
